<compile_context>
chip_gen: v7x
topology: tpu7x:2x2x1
jax: 0.10.0
libtpu: 0.0.40
codegen_flags: <defaults>
</compile_context>

<pallas_src>
import jax
import jax.numpy as jnp
from jax.experimental import pallas as pl
from jax.experimental.pallas import tpu as pltpu


def _round_up(x, m):
    return ((x + m - 1) // m) * m


def _pad2(a, rows, cols):
    return jnp.pad(a, ((0, rows - a.shape[0]), (0, cols - a.shape[1])))


def _vmem_budgets():
    """Generation-aware (tile budget, vmem_limit_bytes)."""
    try:
        cap = int(getattr(pltpu.get_tpu_info(), "vmem_capacity_bytes", 64 * 1024 * 1024))
    except Exception:
        cap = 64 * 1024 * 1024  # conservative (v7x-sized) fallback
    vmem_limit = min(int(cap * 0.75), 100 * 1024 * 1024)   # ~96 MiB on 128 MiB parts, ~48 MiB on v7x
    tile_budget = min(cap // 3, 48 * 1024 * 1024)          # ~42 MiB on v5e/v6e, ~21 MiB on v7x
    return tile_budget, vmem_limit


def _choose_tiles(B, n_pad, budget_bytes):
    """Pick (TILE_B, TK, q_resident); 128-aligned, VMEM footprint under budget."""
    # Batch tile: big (fewer ~0.35us grid steps), but guarantee >= 2 batch tiles when
    # B >= 256 so the "parallel" axis can shard across both v7x TensorCores.
    tile_b = min(512, _round_up(B, 128))
    if B >= 256:
        tile_b = min(tile_b, _round_up((B + 1) // 2, 128))

    # TK = MXU output width after the contraction reorder; prefer multiples of 256
    # (256-wide MXU on v6e/v7x), 128 only as a last resort.
    if n_pad <= 512:
        tk = n_pad
    else:
        tk = next(c for c in (512, 256, 128) if n_pad % c == 0)

    def footprint(tb, tk_, q_res):
        x1 = 2 * tb * tk_ * 4                                    # f32 slabs, double-buffered
        x2 = 2 * tb * n_pad * 2                                  # bf16, resident per batch tile
        q = 2 * (n_pad * n_pad if q_res else n_pad * tk_) * 2    # bf16 (conservatively 2 buffers)
        acc = tb * tk_ * 4                                       # f32 scratch accumulator
        u = tb * tk_ * 4                                         # f32 MXU result live range
        out = 2 * 8 * tb * 4
        return x1 + x2 + q + acc + u + out

    q_resident = footprint(tile_b, tk, True) <= budget_bytes
    while (footprint(tile_b, tk, q_resident) > budget_bytes and tk > 128
           and (tk // 2) % 128 == 0 and n_pad % (tk // 2) == 0):
        tk //= 2
    while footprint(tile_b, tk, q_resident) > budget_bytes and tile_b > 128:
        tile_b = _round_up(tile_b // 2, 128)
    return tile_b, tk, q_resident


def _bilinear_small_kernel(x1_ref, x2_ref, qt_ref, o_ref):
    # Single block, all f32: x1,x2 (B_pad, N_PAD), qt (N_PAD, N_PAD), o (1, B_pad).
    u = jnp.dot(x2_ref[...], qt_ref[...], preferred_element_type=jnp.float32)  # x2 @ Q^T
    o_ref[...] = jnp.sum(x1_ref[...] * u, axis=-1)[None, :]


def _bilinear_tiled_kernel(x1_ref, x2_ref, qt_ref, o_ref, acc_ref):
    # x1_ref : (TILE_B, TK)                  f32  -- k-th feature slab (VPU operand only)
    # x2_ref : (TILE_B, N_PAD)               bf16 -- resident across k (MXU operand)
    # qt_ref : (N_PAD, TK) or (N_PAD, N_PAD) bf16 -- Q^T column slab / fully resident
    # o_ref  : (1, TILE_B)                   f32  -- lane-dense output, written on last k
    # acc_ref: (TILE_B, TK)                  f32  -- elementwise partial-product accumulator
    k = pl.program_id(1)
    tk = acc_ref.shape[1]

    @pl.when(k == 0)
    def _init():
        acc_ref[...] = jnp.zeros_like(acc_ref)

    if qt_ref.shape[1] == tk:                      # streamed slab (or resident with nk == 1)
        qt = qt_ref[...]
    else:                                          # fully resident Q^T: slice k-th column slab
        start = pl.multiple_of(k * tk, tk)
        qt = qt_ref[:, pl.ds(start, tk)]

    # u[b, i] = sum_j x2[b, j] * Q[i, j] for i in the k-th slab  (MXU, f32 accumulation)
    u = jnp.dot(x2_ref[...], qt, preferred_element_type=jnp.float32)
    # Small elementwise multiply-accumulate; the XLU lane-reduce is deferred to the last step.
    acc_ref[...] += x1_ref[...] * u

    @pl.when(k == pl.num_programs(1) - 1)
    def _finalize():
        o_ref[...] = jnp.sum(acc_ref[...], axis=-1)[None, :]


def bilinear_layer_forward(x1, x2, weight, forced_min_val,
                           compute_dtype=jnp.bfloat16):
    """Pallas forward of BilinearLayer.

    x1, x2 : (B, n) float32
    weight : (1, n, n) float32   (nn.Bilinear weight, out_features=1)
    returns: (B, 1) float32
    """
    B, n = x1.shape
    assert x2.shape == (B, n)
    assert weight.shape == (1, n, n)

    # Q = triu(clamp(W, min)) hoisted out of the kernel; the kernels consume Q^T because
    # the contraction is reordered as u = x2 @ Q^T, out = sum_i x1 * u.
    q = jnp.triu(jnp.maximum(weight[0].astype(jnp.float32), jnp.float32(forced_min_val)))
    qt = q.T
    n_pad = _round_up(n, 128)

    # ---- small-problem fast path: single block, all f32, no grid machinery ----
    if B <= 256 and n_pad <= 1024:
        b_pad = _round_up(B, 8)
        x1p = _pad2(x1.astype(jnp.float32), b_pad, n_pad)
        x2p = _pad2(x2.astype(jnp.float32), b_pad, n_pad)
        qtp = _pad2(qt, n_pad, n_pad)
        out = pl.pallas_call(
            _bilinear_small_kernel,
            out_shape=jax.ShapeDtypeStruct((1, b_pad), jnp.float32),
        )(x1p, x2p, qtp)
        return out[0, :B][:, None]

    # ---- general tiled path: grid = (batch tiles, K slabs) ----
    budget, vmem_limit = _vmem_budgets()
    tile_b, tk, q_resident = _choose_tiles(B, n_pad, budget)
    b_pad = _round_up(B, tile_b)
    nb, nk = b_pad // tile_b, n_pad // tk

    # Zero padding is numerically free (zeros contribute nothing to the bilinear form).
    x1p = _pad2(x1.astype(jnp.float32), b_pad, n_pad)                        # f32 VPU operand
    x2p = _pad2(x2.astype(jnp.float32), b_pad, n_pad).astype(compute_dtype)  # bf16 MXU operand
    qtp = _pad2(qt, n_pad, n_pad).astype(compute_dtype)                      # bf16 MXU operand

    if q_resident:
        # DMA'd once for the whole grid (index map constant) and reused by every tile.
        q_spec = pl.BlockSpec((n_pad, n_pad), lambda i, k: (0, 0))
    else:
        q_spec = pl.BlockSpec((n_pad, tk), lambda i, k: (0, k))

    # TODO(synk): block-sparse (ki, kj) tiling via PrefetchScalarGridSpec to skip the
    # all-zero below-diagonal Q blocks (~2x MXU FLOPs at large n when Q is streamed);
    # with resident Q / row-slab streaming every slab touches nonzero columns.
    out = pl.pallas_call(
        _bilinear_tiled_kernel,
        out_shape=jax.ShapeDtypeStruct((1, b_pad), jnp.float32),
        grid=(nb, nk),
        in_specs=[
            pl.BlockSpec((tile_b, tk), lambda i, k: (i, k)),      # x1 slab (f32)
            pl.BlockSpec((tile_b, n_pad), lambda i, k: (i, 0)),   # x2 resident over k (bf16)
            q_spec,                                               # Q^T slab / resident (bf16)
        ],
        out_specs=pl.BlockSpec((1, tile_b), lambda i, k: (0, i)),  # lane-dense output
        scratch_shapes=[pltpu.VMEM((tile_b, tk), jnp.float32)],    # partial-product accumulator
        compiler_params=pltpu.CompilerParams(
            dimension_semantics=("parallel", "arbitrary"),
            vmem_limit_bytes=vmem_limit,
        ),
    )(x1p, x2p, qtp)

    return out[0, :B][:, None]


def init_bilinear_weight(key, n, init_type="near_id"):
    """Deterministic weight init mirroring BilinearLayer.initialize_weights ('near_id')."""
    w = jnp.eye(n, dtype=jnp.float32)[None, :, :]
    if init_type == "near_id":
        w = w + 0.01 * jax.random.normal(key, (1, n, n), dtype=jnp.float32)
    return w


def _reference(x1, x2, weight, forced_min_val):
    q = jnp.triu(jnp.maximum(weight[0], forced_min_val))
    return jnp.einsum("bi,ij,bj->b", x1, q, x2)[:, None]


if __name__ == "__main__":
    forced_min_val = 0.0
    key = jax.random.PRNGKey(0)

    # --- 1) small shapes natural to the module: exercises the single-block fast path ---
    B, n = 8, 32
    k_w, k_x1, k_x2, key = jax.random.split(key, 4)
    weight = init_bilinear_weight(k_w, n, init_type="near_id")
    x1 = jax.random.normal(k_x1, (B, n), dtype=jnp.float32)
    x2 = jax.random.normal(k_x2, (B, n), dtype=jnp.float32)

    out = jax.block_until_ready(bilinear_layer_forward(x1, x2, weight, forced_min_val))
    ref = _reference(x1, x2, weight, forced_min_val)
    assert out.shape == (B, 1)
    assert jnp.allclose(out, ref, atol=1e-1, rtol=2e-2), (out, ref)

    # --- 2) moderate shapes: exercises the tiled, pipelined, resident-Q path ---
    B2, n2 = 512, 1024
    k_w2, k_x1b, k_x2b, key = jax.random.split(key, 4)
    weight2 = init_bilinear_weight(k_w2, n2, init_type="near_id")
    x1b = jax.random.normal(k_x1b, (B2, n2), dtype=jnp.float32)
    x2b = jax.random.normal(k_x2b, (B2, n2), dtype=jnp.float32)

    out2 = jax.block_until_ready(bilinear_layer_forward(x1b, x2b, weight2, forced_min_val))
    ref2 = _reference(x1b, x2b, weight2, forced_min_val)
    assert out2.shape == (B2, 1)
    # x2 / Q go through bf16 on the MXU (f32 accumulation) -> loose tolerance vs f32 ref.
    assert jnp.allclose(out2, ref2, atol=1.0, rtol=5e-2), (
        float(jnp.max(jnp.abs(out2 - ref2))))

    print("KERNEL_OK")
</pallas_src>

<mosaic_0001>
module attributes {stable_mosaic.version = 11 : i64} {
  func.func @_bilinear_small_kernel(%arg0: memref<8x128xf32, #tpu.memory_space<vmem>>, %arg1: memref<8x128xf32, #tpu.memory_space<vmem>>, %arg2: memref<128x128xf32, #tpu.memory_space<vmem>>, %arg3: memref<1x8xf32, #tpu.memory_space<vmem>>) attributes {dimension_semantics = [], scalar_prefetch = 0 : i64, scratch_operands = 0 : i64, tpu.core_type = #tpu.core_type<tc>} {
    %c0 = arith.constant 0 : index
    %c0_0 = arith.constant 0 : index
    %0 = vector.load %arg1[%c0, %c0_0] : memref<8x128xf32, #tpu.memory_space<vmem>>, vector<8x128xf32>
    %c0_1 = arith.constant 0 : index
    %c0_2 = arith.constant 0 : index
    %1 = vector.load %arg2[%c0_1, %c0_2] : memref<128x128xf32, #tpu.memory_space<vmem>>, vector<128x128xf32>
    %cst = arith.constant dense<0.000000e+00> : vector<8x128xf32>
    %2 = tpu.matmul %0, %1, %cst {dimension_numbers = #tpu.dot_dimension_numbers<[1], [0], [0], [1], [0, 0, 1, 1], [], []>} : vector<8x128xf32>, vector<128x128xf32>, vector<8x128xf32> -> vector<8x128xf32>
    %c0_3 = arith.constant 0 : index
    %c0_4 = arith.constant 0 : index
    %3 = vector.load %arg0[%c0_3, %c0_4] : memref<8x128xf32, #tpu.memory_space<vmem>>, vector<8x128xf32>
    %4 = arith.mulf %3, %2 : vector<8x128xf32>
    %cst_5 = arith.constant dense<0.000000e+00> : vector<8xf32>
    %5 = vector.multi_reduction <add>, %4, %cst_5 [1] : vector<8x128xf32> to vector<8xf32>
    %6 = vector.shape_cast %5 : vector<8xf32> to vector<1x8xf32>
    %c0_6 = arith.constant 0 : index
    %c0_7 = arith.constant 0 : index
    %7 = vector.load %arg3[%c0_6, %c0_7] : memref<1x8xf32, #tpu.memory_space<vmem>>, vector<1x8xf32>
    tpu.vector_store %arg3[%c0_6, %c0_7], %6 {strides = array<i32>} : memref<1x8xf32, #tpu.memory_space<vmem>>, vector<1x8xf32>,
    return
  }
}

</mosaic_0001>

<bundles_post_ra>
// kernel: tpu_custom_call.1
= control target key start
LH: loop header
LB: loop body
LE: loop exit
PB: predicated region body
PF: predicated region fallthrough
CT: control target
= control target key end

     0   :  { %8 = vsyncpa [#allocation3], 0  ;;  %s425_s0 = inlined_call_operand.hbm [shape: f32[8,128], index: 0, kind: input, shape index: {}]   ;;  %s426_s1 = inlined_call_operand.hbm [shape: f32[8,128], index: 1, kind: input, shape index: {}]   ;;  %s427_s2 = inlined_call_operand.hbm [shape: f32[128,128], index: 2, kind: input, shape index: {}]   ;;  %s428_s3 = inlined_call_operand.hbm [shape: f32[1,8], index: 3, kind: output, shape index: {}]  }
   0x1   :  { %9 = vsyncpa [#allocation6], 0 }
   0x2   :  { %10 = vsyncpa [#allocation4], 0  ;;  %s348_s12 = smov [#allocation5]   ;;  %s349_s14 = smov [#allocation2]  }
   0x3   :  { %s27_s13 = sshll.u32 %s348_s12, 4  ;;  %s17_s15 = sshll.u32 %s349_s14, 4  ;;  %s28_s13 = int_to_ptr.vmem [resolvable:$true] %s27_s13  ;;  %s18_s15 = int_to_ptr.vmem [resolvable:$true] %s17_s15 }
   0x4   :  { %s254_s18 = scalar_lea.hbm %s426_s1, 128 }
   0x5   :  { %p255_p0 = scmp.ne.s32.totalorder %s426_s1, %s254_s18  ;;  %p258_p1 = scmp.lt.u32.totalorder %s254_s18, %s426_s1 }
   0x7   :  { %p260_p2 = pnand %p258_p1, %p255_p0 }
   0x9   :  { %263 = shalt.err (!%p260_p2)
}
   0xa   :  { %s264_s23 = scalar_lea.vmem %s28_s13, 128  ;;  %p269_p4 = scmp.lt.s32.totalorder %s28_s13, %s28_s13 }
   0xb   :  { %p265_p3 = scmp.ne.s32.totalorder %s28_s13, %s264_s23  ;;  %p270_p5 = scmp.lt.s32.totalorder %s264_s23, %s264_s23 }
   0xd   :  { %p271_p6 = por %p270_p5, %p269_p4 }
   0xf   :  { %p272_p7 = pnand %p271_p6, %p265_p3 }
  0x11   :  { %275 = shalt.err (!%p272_p7)
}
  0x12   :  { %30 = dma.hbm_to_vmem [thread:$0]  %s426_s1, 128, %s28_s13, [#allocation6]  }
  0x13   :  { %s276_s28 = scalar_lea.hbm %s425_s0, 128 }
  0x14   :  { %p277_p8 = scmp.ne.s32.totalorder %s425_s0, %s276_s28  ;;  %p280_p9 = scmp.lt.u32.totalorder %s276_s28, %s425_s0 }
  0x16   :  { %p282_p10 = pnand %p280_p9, %p277_p8 }
  0x18   :  { %285 = shalt.err (!%p282_p10)
}
  0x19   :  { %s286_s6 = scalar_lea.vmem %s18_s15, 128  ;;  %p291_p12 = scmp.lt.s32.totalorder %s18_s15, %s18_s15 }
  0x1a   :  { %p287_p11 = scmp.ne.s32.totalorder %s18_s15, %s286_s6  ;;  %p292_p13 = scmp.lt.s32.totalorder %s286_s6, %s286_s6 }
  0x1c   :  { %p293_p0 = por %p292_p13, %p291_p12 }
  0x1e   :  { %p294_p1 = pnand %p293_p0, %p287_p11 }
  0x20   :  { %297 = shalt.err (!%p294_p1)
}
  0x21   :  { %20 = dma.hbm_to_vmem [thread:$0]  %s425_s0, 128, %s18_s15, [#allocation3]  }
  0x22   :  { %s350_s8 = smov [#allocation7]   ;;  %s298_s12 = scalar_lea.hbm %s427_s2, 2048 }
  0x23   :  { %s36_s9 = sshll.u32 %s350_s8, 4  ;;  %p299_p2 = scmp.ne.s32.totalorder %s427_s2, %s298_s12  ;;  %s37_s9 = int_to_ptr.vmem [resolvable:$true] %s36_s9 }
  0x24   :  { %p302_p3 = scmp.lt.u32.totalorder %s298_s12, %s427_s2 }
  0x26   :  { %p304_p4 = pnand %p302_p3, %p299_p2 }
  0x28   :  { %307 = shalt.err (!%p304_p4)
}
  0x29   :  { %s308_s18 = scalar_lea.vmem %s37_s9, 2048  ;;  %p313_p6 = scmp.lt.s32.totalorder %s37_s9, %s37_s9 }
  0x2a   :  { %p309_p5 = scmp.ne.s32.totalorder %s37_s9, %s308_s18  ;;  %p314_p7 = scmp.lt.s32.totalorder %s308_s18, %s308_s18 }
  0x2c   :  { %p315_p8 = por %p314_p7, %p313_p6 }
  0x2e   :  { %p316_p9 = pnand %p315_p8, %p309_p5 }
  0x30   :  { %319 = shalt.err (!%p316_p9)
}
  0x31   :  { %s351_s0 = smov 128   ;;  %s352_s15 = smov 8  }
  0x32   :  { %42 = dma.hbm_to_vmem [thread:$0]  %s427_s2, 2048, %s37_s9, [#allocation6], %s351_s0, %s351_s0, %s352_s15  }
  0x33   :  { %342 = dma.done.wait [#allocation3], 128  }
  0x34   :  { %343 = vsyncadd [#allocation3], 4294967168 }
  0x35   :  { %344 = dma.done.wait [#allocation6], 2176  }
  0x36   :  { %345 = vsyncadd [#allocation6], 4294965120  ;;  %v353_v0 = vmov 0.0|0.0   ;;  %vm354_vm0 = vmmov 0   ;;  %v355_v1 = vmov 0.0   ;;  %v53_v2 = vld [vmem:[#allocation7] sm:$0xff]  ;;  %v144_v31 = vlaneseq }
  0x37   :  { %221 = vmatprep.subr.bf16.mxu0 %v353_v0  ;;  %218 = vmatprep.mubr.msk.f32.mxu0 %vm354_vm0, %v355_v1  ;;  %v54_v3 = vld [vmem:[#allocation7 + $0x8] sm:$0xff]  ;;  %v55_v4 = vld [vmem:[#allocation7 + $0x10] sm:$0xff]  ;;  %v56_v6 = vld [vmem:[#allocation7 + $0x18] sm:$0xff]  ;;  %s356_s2 = smov [#allocation8]   ;;  %vm151_vm1 = vcmask 57344  }
  0x38   :  { %v222_v5 = vpack.c.bf16 %v54_v3, %v53_v2  ;;  %v225_v7 = vpack.c.bf16 %v56_v6, %v55_v4  ;;  %v57_v8 = vld [vmem:[#allocation7 + $0x20] sm:$0xff]  ;;  %v58_v9 = vld [vmem:[#allocation7 + $0x28] sm:$0xff]  ;;  %v59_v11 = vld [vmem:[#allocation7 + $0x30] sm:$0xff]  ;;  %v145_v32 = vand.u32 127, %v144_v31  ;;  %v147_v33 = vshrl.u32 %v144_v31, 7  ;;  %s159_s21 = sshll.u32 %s356_s2, 4  ;;  %s160_s21 = int_to_ptr.vmem [resolvable:$true] %s159_s21 }
  0x39   :  { %v228_v10 = vpack.c.bf16 %v58_v9, %v57_v8  ;;  %v60_v12 = vld [vmem:[#allocation7 + $0x38] sm:$0xff]  ;;  %v61_v14 = vld [vmem:[#allocation7 + $0x40] sm:$0xff]  ;;  %v62_v15 = vld [vmem:[#allocation7 + $0x48] sm:$0xff]  ;;  %s320_s22 = scalar_lea.vmem %s160_s21, 16  ;;  %s324_s23 = scalar_lea.vmem %s160_s21, 32 }
  0x3a   :  { %223 = vmatpush3.bf16.msra.mxu0 %v222_v5  ;;  %v231_v13 = vpack.c.bf16 %v60_v12, %v59_v11  ;;  %v234_v16 = vpack.c.bf16 %v62_v15, %v61_v14  ;;  %v63_v17 = vld [vmem:[#allocation7 + $0x50] sm:$0xff]  ;;  %v64_v18 = vld [vmem:[#allocation7 + $0x58] sm:$0xff]  ;;  %v65_v20 = vld [vmem:[#allocation7 + $0x60] sm:$0xff]  ;;  %v148_v34 = vsub.s32 %v145_v32, %v147_v33  ;;  %p321_p10 = scmp.ne.s32.totalorder %s160_s21, %s320_s22  ;;  %p325_p11 = scmp.lt.s32.totalorder %s160_s21, %s160_s21 }
  0x3b   :  { %224 = vmatprep.subr.bf16.mxu0 %v353_v0  ;;  %v237_v19 = vpack.c.bf16 %v64_v18, %v63_v17  ;;  %v66_v21 = vld [vmem:[#allocation7 + $0x68] sm:$0xff]  ;;  %v67_v23 = vld [vmem:[#allocation7 + $0x70] sm:$0xff]  ;;  %v68_v24 = vld [vmem:[#allocation7 + $0x78] sm:$0xff]  ;;  %p326_p12 = scmp.lt.s32.totalorder %s324_s23, %s320_s22 }
  0x3c   :  { %v240_v22 = vpack.c.bf16 %v66_v21, %v65_v20  ;;  %v243_v25 = vpack.c.bf16 %v68_v24, %v67_v23  ;;  %v52_v26 = vld [vmem:[#allocation5] sm:$0xff]  ;;  %v139_v27 = vld [vmem:[#allocation2] sm:$0xff] }
  0x3d   :  { %p327_p13 = por %p326_p12, %p325_p11 }
  0x3e   :  { %226 = vmatpush3.bf16.msra.mxu0 %v225_v7 }
  0x3f   :  { %227 = vmatprep.subr.bf16.mxu0 %v353_v0  ;;  %p328_p0 = pnand %p327_p13, %p321_p10 }
  0x42   :  { %229 = vmatpush3.bf16.msra.mxu0 %v228_v10 }
  0x43   :  { %230 = vmatprep.subr.bf16.mxu0 %v353_v0 }
  0x46   :  { %232 = vmatpush3.bf16.msra.mxu0 %v231_v13 }
  0x47   :  { %233 = vmatprep.subr.bf16.mxu0 %v353_v0 }
  0x4a   :  { %235 = vmatpush3.bf16.msra.mxu0 %v234_v16 }
  0x4b   :  { %236 = vmatprep.subr.bf16.mxu0 %v353_v0 }
  0x4e   :  { %238 = vmatpush3.bf16.msra.mxu0 %v237_v19 }
  0x4f   :  { %239 = vmatprep.subr.bf16.mxu0 %v353_v0 }
  0x52   :  { %241 = vmatpush3.bf16.msra.mxu0 %v240_v22 }
  0x53   :  { %242 = vmatprep.subr.bf16.mxu0 %v353_v0 }
  0x56   :  { %244 = vmatpush3.bf16.msra.mxu0 %v243_v25 }
  0x59   :  { %219 = vmatmul.mubr.f32.vlgmr.msra.gmra.mrb[0].mxu0 %v52_v26 }
 0x12c   :  { %v135_v28 = vpop.f32.mrb[0].mxu0 }
 0x12d   :  { %v220_v29 = vpop.f32.mrb[1].mxu0  ;;  %v140_v30 = vmul.f32 %v139_v27, %v135_v28 }
 0x12f   :  { %141 = vadd.xlane.f32.xlu0 %v140_v30 }
 0x1bc   :  { %v142_v35 = vpop.xlane.xlu0 %141 }
 0x1bd   :  { %v149_v36 = vrot.slane %v142_v35, %v148_v34 }
 0x1bf   :  { %152 = vst.msk [vmem:[#allocation8] sm:$0x1] %vm151_vm1, %v149_v36 }
 0x1c0   :  { %331 = shalt.err (!%p328_p0)
}
 0x1c1   :  { %s332_s26 = scalar_lea.hbm %s428_s3, 16 }
 0x1c2   :  { %p333_p1 = scmp.ne.s32.totalorder %s428_s3, %s332_s26  ;;  %p336_p2 = scmp.lt.u32.totalorder %s332_s26, %s428_s3 }
 0x1c4   :  { %p338_p3 = pnand %p336_p2, %p333_p1 }
 0x1c6   :  { %341 = shalt.err (!%p338_p3)
}
 0x1c7   :  { %162 = dma.vmem_to_hbm [thread:$0]  %s160_s21, 16, %s428_s3, [#allocation4]  }
 0x1c8   :  { %346 = dma.done.wait [#allocation4], 16  }
 0x1c9   :  { %347 = vsyncadd [#allocation4], 4294967280 }
 0x1ca   :  { %166 = vsyncpa [#allocation3], 1 }
 0x1cb   :  { %167 = vsyncpa [#allocation6], 1 }
 0x1cc   :  { %168 = vsyncpa [#allocation4], 1 }

</bundles_post_ra>
